<compile_context>
chip_gen: v6e
topology: v6e:2x2x1
jax: 0.10.0
libtpu: 0.0.40
codegen_flags: <defaults>
</compile_context>

<pallas_src>
import jax
import jax.numpy as jnp
from jax.experimental import pallas as pl
from jax.experimental.pallas import tpu as pltpu

R, C = 128, 128  # memory parameter shape from Net.__init__


def _mul_clamp_kernel(mem_ref, x_ref, o_ref):
    # elementwise hot path: multiply by the learned "memory" and clamp to [0,1]
    o_ref[...] = jnp.clip(mem_ref[...] * x_ref[...], 0.0, 1.0)


def net_forward(memory: jax.Array, x: jax.Array) -> jax.Array:
    assert memory.shape == (R, C)
    assert x.shape == (R, C)
    vmem_spec = pl.BlockSpec(memory_space=pltpu.MemorySpace.VMEM)
    return pl.pallas_call(
        _mul_clamp_kernel,
        out_shape=jax.ShapeDtypeStruct((R, C), x.dtype),
        in_specs=[vmem_spec, vmem_spec],
        out_specs=vmem_spec,
        # output reuses x's buffer (inputs: 0 = memory, 1 = x)
        input_output_aliases={1: 0},
    )(memory, x)


if __name__ == "__main__":
    key = jax.random.PRNGKey(0)
    k_mem, k_x = jax.random.split(key)

    # deterministic parameter init (mirrors torch.rand((128,128)))
    memory = jax.random.uniform(k_mem, (R, C), dtype=jnp.float32)
    # example input (values both inside and outside [0,1] to exercise clamp)
    x = jax.random.uniform(k_x, (R, C), dtype=jnp.float32) * 2.0 - 0.5

    # reference computed BEFORE the kernel call (output aliases x's buffer)
    y_ref = jnp.clip(memory * x, 0.0, 1.0)
    jax.block_until_ready(y_ref)

    y = net_forward(memory, x)
    jax.block_until_ready(y)

    assert jnp.allclose(y, y_ref, atol=1e-6), "mismatch vs reference"

    print("KERNEL_OK")
</pallas_src>

<mosaic_0001>
module attributes {stable_mosaic.version = 11 : i64} {
  func.func @_mul_clamp_kernel(%arg0: memref<128x128xf32, #tpu.memory_space<vmem>>, %arg1: memref<128x128xf32, #tpu.memory_space<vmem>>, %arg2: memref<128x128xf32, #tpu.memory_space<vmem>>) attributes {dimension_semantics = [], scalar_prefetch = 0 : i64, scratch_operands = 0 : i64, tpu.core_type = #tpu.core_type<tc>} {
    %c0 = arith.constant 0 : index
    %c0_0 = arith.constant 0 : index
    %0 = vector.load %arg0[%c0, %c0_0] : memref<128x128xf32, #tpu.memory_space<vmem>>, vector<128x128xf32>
    %c0_1 = arith.constant 0 : index
    %c0_2 = arith.constant 0 : index
    %1 = vector.load %arg1[%c0_1, %c0_2] : memref<128x128xf32, #tpu.memory_space<vmem>>, vector<128x128xf32>
    %2 = arith.mulf %0, %1 : vector<128x128xf32>
    %cst = arith.constant 0.000000e+00 : f32
    %cst_3 = arith.constant 1.000000e+00 : f32
    %3 = vector.broadcast %cst : f32 to vector<128x128xf32>
    %4 = arith.maximumf %3, %2 : vector<128x128xf32>
    %5 = vector.broadcast %cst_3 : f32 to vector<128x128xf32>
    %6 = arith.minimumf %5, %4 : vector<128x128xf32>
    %c0_4 = arith.constant 0 : index
    %c0_5 = arith.constant 0 : index
    %7 = vector.load %arg2[%c0_4, %c0_5] : memref<128x128xf32, #tpu.memory_space<vmem>>, vector<128x128xf32>
    tpu.vector_store %arg2[%c0_4, %c0_5], %6 {strides = array<i32>} : memref<128x128xf32, #tpu.memory_space<vmem>>, vector<128x128xf32>,
    return
  }
}

</mosaic_0001>

<bundles_post_ra>
// kernel: tpu_custom_call.1
= control target key start
LH: loop header
LB: loop body
LE: loop exit
PB: predicated region body
PF: predicated region fallthrough
CT: control target
= control target key end

     0   :  { %7 = vsyncpa [#allocation3], 0  ;;  %s266_s0 = inlined_call_operand.vmem [shape: f32[128,128], index: 0, kind: input, shape index: {}]   ;;  %s267_s1 = inlined_call_operand.hbm [shape: f32[128,128], index: 1, kind: input, shape index: {}, may-alias: {1,2}]   ;;  %s268_s2 = inlined_call_operand.hbm [shape: f32[128,128], index: 2, kind: output, shape index: {}, may-alias: {1,2}]  }
   0x1   :  { %8 = vsyncpa [#allocation4], 0  ;;  %s187_s9 = smov [#allocation2]  }
   0x2   :  { %s16_s10 = sshll.u32 %s187_s9, 4  ;;  %s17_s10 = int_to_ptr.vmem [resolvable:$true] %s16_s10 }
   0x3   :  { %s151_s11 = scalar_lea.vmem %s17_s10, 2048  ;;  %p156_p1 = scmp.lt.s32.totalorder %s17_s10, %s17_s10 }
   0x4   :  { %p152_p0 = scmp.ne.s32.totalorder %s17_s10, %s151_s11  ;;  %p157_p2 = scmp.lt.s32.totalorder %s151_s11, %s151_s11 }
   0x6   :  { %p158_p3 = por %p157_p2, %p156_p1 }
   0x8   :  { %p159_p4 = pnand %p158_p3, %p152_p0 }
   0xa   :  { %162 = shalt.err (!%p159_p4)
}
   0xb   :  { %s188_s12 = smov 128   ;;  %s189_s13 = smov 8  }
   0xc   :  { %22 = dma.hbm_to_vmem [thread:$0]  %s267_s1, 2048, %s17_s10, [#allocation3], %s188_s12, %s188_s12, %s189_s13  }
   0xd   :  { %183 = dma.done.wait [#allocation3], 2048  }
   0xe   :  { %184 = vsyncadd [#allocation3], 4294965248  ;;  %v26_v0 = vld [vmem:[%s266_s0] sm:$0xff]  ;;  %v27_v2 = vld [vmem:[%s266_s0 + $0x8] sm:$0xff] }
   0xf   :  { %v42_v1 = vld [vmem:[#allocation2] sm:$0xff]  ;;  %v43_v4 = vld [vmem:[#allocation2 + $0x8] sm:$0xff]  ;;  %v28_v5 = vld [vmem:[%s266_s0 + $0x10] sm:$0xff] }
  0x10   :  { %v58_v3 = vmul.f32 %v42_v1, %v26_v0  ;;  %v44_v6 = vld [vmem:[#allocation2 + $0x10] sm:$0xff]  ;;  %v59_v7 = vmul.f32 %v43_v4, %v27_v2  ;;  %v29_v9 = vld [vmem:[%s266_s0 + $0x18] sm:$0xff]  ;;  %v30_v11 = vld [vmem:[%s266_s0 + $0x20] sm:$0xff] }
  0x11   :  { %v60_v8 = vmul.f32 %v44_v6, %v28_v5  ;;  %v45_v10 = vld [vmem:[#allocation2 + $0x18] sm:$0xff]  ;;  %v46_v14 = vld [vmem:[#allocation2 + $0x20] sm:$0xff]  ;;  %v31_v15 = vld [vmem:[%s266_s0 + $0x28] sm:$0xff] }
  0x12   :  { %v74_v12 = vmax.f32 %v58_v3, 0.0  ;;  %v61_v13 = vmul.f32 %v45_v10, %v29_v9  ;;  %v47_v16 = vld [vmem:[#allocation2 + $0x28] sm:$0xff]  ;;  %v75_v17 = vmax.f32 %v59_v7, 0.0  ;;  %v62_v19 = vmul.f32 %v46_v14, %v30_v11  ;;  %v32_v21 = vld [vmem:[%s266_s0 + $0x30] sm:$0xff]  ;;  %v33_v23 = vld [vmem:[%s266_s0 + $0x38] sm:$0xff] }
  0x13   :  { %v76_v18 = vmax.f32 %v60_v8, 0.0  ;;  %v63_v20 = vmul.f32 %v47_v16, %v31_v15  ;;  %v48_v22 = vld [vmem:[#allocation2 + $0x30] sm:$0xff]  ;;  %v49_v27 = vld [vmem:[#allocation2 + $0x38] sm:$0xff]  ;;  %v34_v28 = vld [vmem:[%s266_s0 + $0x40] sm:$0xff] }
  0x14   :  { %v90_v24 = vmin.f32 %v74_v12, 1.0  ;;  %v77_v25 = vmax.f32 %v61_v13, 0.0  ;;  %v64_v26 = vmul.f32 %v48_v22, %v32_v21  ;;  %v50_v29 = vld [vmem:[#allocation2 + $0x40] sm:$0xff]  ;;  %v91_v30 = vmin.f32 %v75_v17, 1.0  ;;  %v35_v34 = vld [vmem:[%s266_s0 + $0x48] sm:$0xff]  ;;  %v36_v40 = vld [vmem:[%s266_s0 + $0x50] sm:$0xff] }
  0x15   :  { %v92_v31 = vmin.f32 %v76_v18, 1.0  ;;  %v78_v32 = vmax.f32 %v62_v19, 0.0  ;;  %v79_v33 = vmax.f32 %v63_v20, 0.0  ;;  %v51_v35 = vld [vmem:[#allocation2 + $0x48] sm:$0xff]  ;;  %v65_v38 = vmul.f32 %v49_v27, %v33_v23  ;;  %v52_v41 = vld [vmem:[#allocation2 + $0x50] sm:$0xff]  ;;  %v37_v42 = vld [vmem:[%s266_s0 + $0x58] sm:$0xff] }
  0x16   :  { %106 = vst [vmem:[#allocation5] sm:$0xff] %v90_v24  ;;  %v93_v36 = vmin.f32 %v77_v25, 1.0  ;;  %v80_v37 = vmax.f32 %v64_v26, 0.0  ;;  %v66_v39 = vmul.f32 %v50_v29, %v34_v28  ;;  %107 = vst [vmem:[#allocation5 + $0x8] sm:$0xff] %v91_v30  ;;  %v67_v45 = vmul.f32 %v51_v35, %v35_v34  ;;  %v53_v47 = vld [vmem:[#allocation2 + $0x58] sm:$0xff]  ;;  %v38_v48 = vld [vmem:[%s266_s0 + $0x60] sm:$0xff] }
  0x17   :  { %108 = vst [vmem:[#allocation5 + $0x10] sm:$0xff] %v92_v31  ;;  %v94_v43 = vmin.f32 %v78_v32, 1.0  ;;  %v95_v44 = vmin.f32 %v79_v33, 1.0  ;;  %v68_v46 = vmul.f32 %v52_v41, %v36_v40  ;;  %v54_v49 = vld [vmem:[#allocation2 + $0x60] sm:$0xff]  ;;  %v81_v51 = vmax.f32 %v65_v38, 0.0  ;;  %v39_v54 = vld [vmem:[%s266_s0 + $0x68] sm:$0xff] }
  0x18   :  { %109 = vst [vmem:[#allocation5 + $0x18] sm:$0xff] %v93_v36  ;;  %v96_v50 = vmin.f32 %v80_v37, 1.0  ;;  %v82_v52 = vmax.f32 %v66_v39, 0.0  ;;  %v69_v53 = vmul.f32 %v53_v47, %v37_v42  ;;  %v55_v55 = vld [vmem:[#allocation2 + $0x68] sm:$0xff]  ;;  %v40_v56 = vld [vmem:[%s266_s0 + $0x70] sm:$0xff]  ;;  %v83_v57 = vmax.f32 %v67_v45, 0.0 }
  0x19   :  { %110 = vst [vmem:[#allocation5 + $0x20] sm:$0xff] %v94_v43  ;;  %111 = vst [vmem:[#allocation5 + $0x28] sm:$0xff] %v95_v44  ;;  %v84_v58 = vmax.f32 %v68_v46, 0.0  ;;  %v70_v59 = vmul.f32 %v54_v49, %v38_v48  ;;  %v71_v60 = vmul.f32 %v55_v55, %v39_v54  ;;  %v56_v61 = vld [vmem:[#allocation2 + $0x70] sm:$0xff]  ;;  %v41_v62 = vld [vmem:[%s266_s0 + $0x78] sm:$0xff]  ;;  %v97_v0 = vmin.f32 %v81_v51, 1.0 }
  0x1a   :  { %v57_v63 = vld [vmem:[#allocation2 + $0x78] sm:$0xff]  ;;  %112 = vst [vmem:[#allocation5 + $0x30] sm:$0xff] %v96_v50  ;;  %v98_v1 = vmin.f32 %v82_v52, 1.0  ;;  %v85_v2 = vmax.f32 %v69_v53, 0.0  ;;  %v72_v3 = vmul.f32 %v56_v61, %v40_v56  ;;  %v99_v4 = vmin.f32 %v83_v57, 1.0  ;;  %s190_s0 = smov [#allocation5]  }
  0x1b   :  { %v100_v5 = vmin.f32 %v84_v58, 1.0  ;;  %v86_v6 = vmax.f32 %v70_v59, 0.0  ;;  %v87_v7 = vmax.f32 %v71_v60, 0.0  ;;  %113 = vst [vmem:[#allocation5 + $0x38] sm:$0xff] %v97_v0  ;;  %v73_v10 = vmul.f32 %v57_v63, %v41_v62  ;;  %s127_s21 = sshll.u32 %s190_s0, 4  ;;  %s128_s21 = int_to_ptr.vmem [resolvable:$true] %s127_s21 }
  0x1c   :  { %114 = vst [vmem:[#allocation5 + $0x40] sm:$0xff] %v98_v1  ;;  %v101_v8 = vmin.f32 %v85_v2, 1.0  ;;  %v88_v9 = vmax.f32 %v72_v3, 0.0  ;;  %115 = vst [vmem:[#allocation5 + $0x48] sm:$0xff] %v99_v4  ;;  %s163_s1 = scalar_lea.vmem %s128_s21, 2048  ;;  %p168_p6 = scmp.lt.s32.totalorder %s128_s21, %s128_s21 }
  0x1d   :  { %116 = vst [vmem:[#allocation5 + $0x50] sm:$0xff] %v100_v5  ;;  %v102_v11 = vmin.f32 %v86_v6, 1.0  ;;  %v103_v12 = vmin.f32 %v87_v7, 1.0  ;;  %v89_v14 = vmax.f32 %v73_v10, 0.0  ;;  %p164_p5 = scmp.ne.s32.totalorder %s128_s21, %s163_s1  ;;  %p169_p7 = scmp.lt.s32.totalorder %s163_s1, %s163_s1 }
  0x1e   :  { %117 = vst [vmem:[#allocation5 + $0x58] sm:$0xff] %v101_v8  ;;  %v104_v13 = vmin.f32 %v88_v9, 1.0 }
  0x1f   :  { %118 = vst [vmem:[#allocation5 + $0x60] sm:$0xff] %v102_v11  ;;  %119 = vst [vmem:[#allocation5 + $0x68] sm:$0xff] %v103_v12  ;;  %v105_v15 = vmin.f32 %v89_v14, 1.0  ;;  %p170_p8 = por %p169_p7, %p168_p6 }
  0x20   :  { %120 = vst [vmem:[#allocation5 + $0x70] sm:$0xff] %v104_v13 }
  0x21   :  { %121 = vst [vmem:[#allocation5 + $0x78] sm:$0xff] %v105_v15  ;;  %p171_p9 = pnand %p170_p8, %p164_p5 }
  0x23   :  { %174 = shalt.err (!%p171_p9)
}
  0x24   :  { %133 = dma.vmem_to_hbm [thread:$0]  %s128_s21, 2048, %s268_s2, [#allocation4], %s188_s12, %s188_s12, %s189_s13  }
  0x25   :  { %185 = dma.done.wait [#allocation4], 2048  }
  0x26   :  { %186 = vsyncadd [#allocation4], 4294965248 }
  0x27   :  { %137 = vsyncpa [#allocation3], 1 }
  0x28   :  { %138 = vsyncpa [#allocation4], 1 }

</bundles_post_ra>
